<compile_context>
chip_gen: v5e
topology: v5e:2x2
jax: 0.10.0
libtpu: 0.0.40
codegen_flags: <defaults>
</compile_context>

<pallas_src>
import math

import jax
import jax.numpy as jnp
from jax.experimental import pallas as pl
from jax.experimental.pallas import tpu as pltpu


# ---------------------------------------------------------------------------
# In-kernel GELU (exact, erf-based — matches torch.nn.GELU() default)
# ---------------------------------------------------------------------------
_ERF_ALPHA = (-2.72614225801306e-10, 2.77068142495902e-08, -2.10102402082508e-06,
              -5.69250639462346e-05, -7.34990630326855e-04, -2.95459980854025e-03,
              -1.60960333262415e-02)
_ERF_BETA = (-1.45660718464996e-05, -2.13374055278905e-04, -1.68282697438203e-03,
             -7.37332916720468e-03, -1.42647390514189e-02)


def _erf(x):
    """f32 erf via the Eigen/XLA rational approximation (~1 ulp)."""
    x = jnp.clip(x, -4.0, 4.0)
    x2 = x * x
    p = jnp.float32(_ERF_ALPHA[0])
    for c in _ERF_ALPHA[1:]:
        p = p * x2 + jnp.float32(c)
    p = p * x
    q = jnp.float32(_ERF_BETA[0])
    for c in _ERF_BETA[1:]:
        q = q * x2 + jnp.float32(c)
    return p / q


def _gelu(x):
    return 0.5 * x * (1.0 + _erf(x * 0.7071067811865476))


# ---------------------------------------------------------------------------
# One-time parameter repacking (hoisted out of the per-call path)
# ---------------------------------------------------------------------------
def preprocess_modulate_params(p, h, w):
    """Repack PyTorch-layout Modulate weights into lane-dense kernel slabs.

    Kernel row g holds the channel pair (2g, 2g+1) concatenated along lanes:
    lanes [0, HW) = channel 2g pixels, lanes [HW, 2*HW) = channel 2g+1 pixels.
    The zero-padding validity mask of each 3x3 tap is folded into the weights,
    so in-kernel each tap is just  `weight_slab * roll(x)`.
    """
    c = p["w1"].shape[0]
    co = c // 2
    hw = h * w

    pix = jnp.arange(hw)
    hh, ww = pix // w, pix % w
    masks = []
    for dy in range(3):
        for dx in range(3):
            oy, ox = dy - 1, dx - 1
            m = (hh + oy >= 0) & (hh + oy < h) & (ww + ox >= 0) & (ww + ox < w)
            masks.append(m.astype(jnp.float32))
    mask = jnp.stack(masks)                                   # (9, HW)
    mask_l = jnp.concatenate([mask, mask], axis=-1)           # (9, 2*HW)

    # depthwise 3x3: tap weight per (group, half) broadcast over its HW lanes, mask folded
    w1t = p["w1"][:, 0].reshape(c, 9).transpose(1, 0).reshape(9, co, 2)
    w1s = jnp.repeat(w1t, hw, axis=-1) * mask_l[:, None, :]   # (9, Co, 2*HW)
    b1s = jnp.repeat(p["b1"].reshape(co, 2), hw, axis=-1)     # (Co, 2*HW)

    # grouped 3x3 (2 in-ch / group): same packing, halves = the two input channels
    w2t = p["w2"].reshape(co, 2, 9).transpose(2, 0, 1)
    w2s = jnp.repeat(w2t, hw, axis=-1) * mask_l[:, None, :]   # (9, Co, 2*HW)

    # pointwise 1x1: split into even / odd input channels for MXU matmuls
    wp = p["wp"][:, :, 0, 0]                                  # (Co, C)
    wpe = wp[:, 0::2]                                         # (Co, Co) – even in-channels
    wpo = wp[:, 1::2]                                         # (Co, Co) – odd  in-channels

    bo = (p["b2"] + p["bp"]).reshape(co, 1)                   # combined output bias
    return dict(w1s=w1s, b1s=b1s, w2s=w2s, wpe=wpe, wpo=wpo, bo=bo)


# ---------------------------------------------------------------------------
# Fused Modulate forward: single pallas_call, grid over batch
# ---------------------------------------------------------------------------
def modulate_forward(x, pp):
    n, c, h, w = x.shape
    co = c // 2
    hw = h * w
    L = 2 * hw
    deltas = tuple((dy - 1) * w + (dx - 1) for dy in range(3) for dx in range(3))

    xv = x.reshape(n, co, L)  # free reshape: row g = [channel 2g | channel 2g+1] over H*W

    def kernel(x_ref, w1_ref, b1_ref, w2_ref, wpe_ref, wpo_ref, bo_ref, o_ref):
        xb = x_ref[0]                                         # (Co, L)

        # depthwise 3x3 (groups = C): lane roll per tap, mask folded into weights
        y1 = b1_ref[...]
        for t, d in enumerate(deltas):
            s = xb if d == 0 else pltpu.roll(xb, (-d) % L, 1)
            y1 = y1 + w1_ref[t] * s

        # grouped 3x3 (groups = C//2): one roll serves both channels of the pair,
        # then sum the two lane halves into the (Co, HW) output
        y2 = jnp.zeros((co, hw), jnp.float32)
        for t, d in enumerate(deltas):
            s = y1 if d == 0 else pltpu.roll(y1, (-d) % L, 1)
            tt = w2_ref[t] * s
            y2 = y2 + (tt[:, :hw] + tt[:, hw:])

        # pointwise 1x1 conv on the MXU: even / odd input channels
        pw = (jnp.dot(wpe_ref[...], xb[:, :hw], preferred_element_type=jnp.float32)
              + jnp.dot(wpo_ref[...], xb[:, hw:], preferred_element_type=jnp.float32))

        o_ref[0] = _gelu(y2 + pw + bo_ref[...])

    out = pl.pallas_call(
        kernel,
        out_shape=jax.ShapeDtypeStruct((n, co, hw), jnp.float32),
        grid=(n,),
        in_specs=[
            pl.BlockSpec((1, co, L), lambda i: (i, 0, 0)),    # x (per batch element)
            pl.BlockSpec((9, co, L), lambda i: (0, 0, 0)),    # depthwise tap slabs
            pl.BlockSpec((co, L), lambda i: (0, 0)),          # depthwise bias slab
            pl.BlockSpec((9, co, L), lambda i: (0, 0, 0)),    # grouped tap slabs
            pl.BlockSpec((co, co), lambda i: (0, 0)),         # 1x1 even-channel weights
            pl.BlockSpec((co, co), lambda i: (0, 0)),         # 1x1 odd-channel weights
            pl.BlockSpec((co, 1), lambda i: (0, 0)),          # combined output bias
        ],
        out_specs=pl.BlockSpec((1, co, hw), lambda i: (i, 0, 0)),
        compiler_params=pltpu.CompilerParams(
            dimension_semantics=("parallel",)),               # 2x on v7x (2 TCs)
    )(xv, pp["w1s"], pp["b1s"], pp["w2s"], pp["wpe"], pp["wpo"], pp["bo"])

    return out.reshape(n, co, h, w)


# ---------------------------------------------------------------------------
# Parameter init (mirrors Modulate._init_weights)
# ---------------------------------------------------------------------------
def init_modulate_params(key, dim):
    co = dim // 2
    k1, k2, k3 = jax.random.split(key, 3)
    std_dw1 = math.sqrt(2.0 / (3 * 3 * dim // dim))   # fan_out = 9
    std_dw2 = math.sqrt(2.0 / (3 * 3 * co // co))     # fan_out = 9
    std_pw = math.sqrt(2.0 / (1 * 1 * co // 1))       # fan_out = dim//2
    return dict(
        w1=jax.random.normal(k1, (dim, 1, 3, 3), jnp.float32) * std_dw1,
        b1=jnp.zeros((dim,), jnp.float32),
        w2=jax.random.normal(k2, (co, 2, 3, 3), jnp.float32) * std_dw2,
        b2=jnp.zeros((co,), jnp.float32),
        wp=jax.random.normal(k3, (co, dim, 1, 1), jnp.float32) * std_pw,
        bp=jnp.zeros((co,), jnp.float32),
    )


# ---------------------------------------------------------------------------
# Pure-JAX reference (correctness check only)
# ---------------------------------------------------------------------------
def _conv_ref(x, w, b, groups, pad):
    out = jax.lax.conv_general_dilated(
        x, w, window_strides=(1, 1), padding=((pad, pad), (pad, pad)),
        dimension_numbers=("NCHW", "OIHW", "NCHW"),
        feature_group_count=groups, precision=jax.lax.Precision.HIGHEST)
    return out + b.reshape(1, -1, 1, 1)


def modulate_ref(x, p):
    c = x.shape[1]
    y1 = _conv_ref(x, p["w1"], p["b1"], c, 1)
    y2 = _conv_ref(y1, p["w2"], p["b2"], c // 2, 1)
    pw = _conv_ref(x, p["wp"], p["bp"], 1, 0)
    return jax.nn.gelu(y2 + pw, approximate=False)


# ---------------------------------------------------------------------------
if __name__ == "__main__":
    key = jax.random.PRNGKey(0)
    kx, kp = jax.random.split(key)
    N, DIM, H, W = 2, 8, 16, 16

    x = jax.random.normal(kx, (N, DIM, H, W), jnp.float32)
    params = init_modulate_params(kp, DIM)
    packed = preprocess_modulate_params(params, H, W)   # one-time repack, outside jit

    fwd = jax.jit(modulate_forward)
    out = jax.block_until_ready(fwd(x, packed))

    ref = modulate_ref(x, params)
    assert out.shape == (N, DIM // 2, H, W), out.shape
    max_err = float(jnp.max(jnp.abs(out - ref)))
    if not bool(jnp.allclose(out, ref, atol=2e-3, rtol=2e-3)):
        raise AssertionError(f"Pallas Modulate mismatch vs reference, max abs err = {max_err}")
    print("KERNEL_OK")
</pallas_src>

<mosaic_0001>
module attributes {stable_mosaic.version = 11 : i64} {
  func.func @kernel(%arg0: i32, %arg1: memref<1x4x512xf32, #tpu.memory_space<vmem>>, %arg2: memref<9x4x512xf32, #tpu.memory_space<vmem>>, %arg3: memref<4x512xf32, #tpu.memory_space<vmem>>, %arg4: memref<9x4x512xf32, #tpu.memory_space<vmem>>, %arg5: memref<4x4xf32, #tpu.memory_space<vmem>>, %arg6: memref<4x4xf32, #tpu.memory_space<vmem>>, %arg7: memref<4x1xf32, #tpu.memory_space<vmem>>, %arg8: memref<1x4x256xf32, #tpu.memory_space<vmem>>) attributes {dimension_semantics = [#tpu.dimension_semantics<parallel>], iteration_bounds = array<i64: 2>, scalar_prefetch = 0 : i64, scratch_operands = 0 : i64, tpu.core_type = #tpu.core_type<tc>, window_params = [{transform_indices = @transform_0, window_bounds = array<i64: 1, 4, 512>}, {pipeline_mode = #tpu.pipeline_mode<synchronous>, transform_indices = @transform_1, window_bounds = array<i64: 9, 4, 512>}, {pipeline_mode = #tpu.pipeline_mode<synchronous>, transform_indices = @transform_2, window_bounds = array<i64: 4, 512>}, {pipeline_mode = #tpu.pipeline_mode<synchronous>, transform_indices = @transform_3, window_bounds = array<i64: 9, 4, 512>}, {pipeline_mode = #tpu.pipeline_mode<synchronous>, transform_indices = @transform_4, window_bounds = array<i64: 4, 4>}, {pipeline_mode = #tpu.pipeline_mode<synchronous>, transform_indices = @transform_5, window_bounds = array<i64: 4, 4>}, {pipeline_mode = #tpu.pipeline_mode<synchronous>, transform_indices = @transform_6, window_bounds = array<i64: 4, 1>}, {transform_indices = @transform_7, window_bounds = array<i64: 1, 4, 256>}]} {
    %c0 = arith.constant 0 : index
    %c0_0 = arith.constant 0 : index
    %c0_1 = arith.constant 0 : index
    %0 = vector.load %arg1[%c0, %c0_0, %c0_1] : memref<1x4x512xf32, #tpu.memory_space<vmem>>, vector<1x4x512xf32>
    %1 = vector.shape_cast %0 : vector<1x4x512xf32> to vector<4x512xf32>
    %c0_2 = arith.constant 0 : index
    %c0_3 = arith.constant 0 : index
    %2 = vector.load %arg3[%c0_2, %c0_3] : memref<4x512xf32, #tpu.memory_space<vmem>>, vector<4x512xf32>
    %c17_i32 = arith.constant 17 : i32
    %3 = tpu.dynamic_rotate %1 by %c17_i32 dim 1 : vector<4x512xf32>, i32 -> vector<4x512xf32>
    %c0_4 = arith.constant 0 : index
    %c0_5 = arith.constant 0 : index
    %c0_6 = arith.constant 0 : index
    %4 = vector.load %arg2[%c0_4, %c0_5, %c0_6] : memref<9x4x512xf32, #tpu.memory_space<vmem>>, vector<1x4x512xf32>
    %5 = vector.shape_cast %4 : vector<1x4x512xf32> to vector<4x512xf32>
    %6 = arith.mulf %5, %3 : vector<4x512xf32>
    %7 = arith.addf %2, %6 : vector<4x512xf32>
    %c16_i32 = arith.constant 16 : i32
    %8 = tpu.dynamic_rotate %1 by %c16_i32 dim 1 : vector<4x512xf32>, i32 -> vector<4x512xf32>
    %c1 = arith.constant 1 : index
    %c0_7 = arith.constant 0 : index
    %c0_8 = arith.constant 0 : index
    %9 = vector.load %arg2[%c1, %c0_7, %c0_8] : memref<9x4x512xf32, #tpu.memory_space<vmem>>, vector<1x4x512xf32>
    %10 = vector.shape_cast %9 : vector<1x4x512xf32> to vector<4x512xf32>
    %11 = arith.mulf %10, %8 : vector<4x512xf32>
    %12 = arith.addf %7, %11 : vector<4x512xf32>
    %c15_i32 = arith.constant 15 : i32
    %13 = tpu.dynamic_rotate %1 by %c15_i32 dim 1 : vector<4x512xf32>, i32 -> vector<4x512xf32>
    %c2 = arith.constant 2 : index
    %c0_9 = arith.constant 0 : index
    %c0_10 = arith.constant 0 : index
    %14 = vector.load %arg2[%c2, %c0_9, %c0_10] : memref<9x4x512xf32, #tpu.memory_space<vmem>>, vector<1x4x512xf32>
    %15 = vector.shape_cast %14 : vector<1x4x512xf32> to vector<4x512xf32>
    %16 = arith.mulf %15, %13 : vector<4x512xf32>
    %17 = arith.addf %12, %16 : vector<4x512xf32>
    %c1_i32 = arith.constant 1 : i32
    %18 = tpu.dynamic_rotate %1 by %c1_i32 dim 1 : vector<4x512xf32>, i32 -> vector<4x512xf32>
    %c3 = arith.constant 3 : index
    %c0_11 = arith.constant 0 : index
    %c0_12 = arith.constant 0 : index
    %19 = vector.load %arg2[%c3, %c0_11, %c0_12] : memref<9x4x512xf32, #tpu.memory_space<vmem>>, vector<1x4x512xf32>
    %20 = vector.shape_cast %19 : vector<1x4x512xf32> to vector<4x512xf32>
    %21 = arith.mulf %20, %18 : vector<4x512xf32>
    %22 = arith.addf %17, %21 : vector<4x512xf32>
    %c4 = arith.constant 4 : index
    %c0_13 = arith.constant 0 : index
    %c0_14 = arith.constant 0 : index
    %23 = vector.load %arg2[%c4, %c0_13, %c0_14] : memref<9x4x512xf32, #tpu.memory_space<vmem>>, vector<1x4x512xf32>
    %24 = vector.shape_cast %23 : vector<1x4x512xf32> to vector<4x512xf32>
    %25 = arith.mulf %24, %1 : vector<4x512xf32>
    %26 = arith.addf %22, %25 : vector<4x512xf32>
    %c511_i32 = arith.constant 511 : i32
    %27 = tpu.dynamic_rotate %1 by %c511_i32 dim 1 : vector<4x512xf32>, i32 -> vector<4x512xf32>
    %c5 = arith.constant 5 : index
    %c0_15 = arith.constant 0 : index
    %c0_16 = arith.constant 0 : index
    %28 = vector.load %arg2[%c5, %c0_15, %c0_16] : memref<9x4x512xf32, #tpu.memory_space<vmem>>, vector<1x4x512xf32>
    %29 = vector.shape_cast %28 : vector<1x4x512xf32> to vector<4x512xf32>
    %30 = arith.mulf %29, %27 : vector<4x512xf32>
    %31 = arith.addf %26, %30 : vector<4x512xf32>
    %c497_i32 = arith.constant 497 : i32
    %32 = tpu.dynamic_rotate %1 by %c497_i32 dim 1 : vector<4x512xf32>, i32 -> vector<4x512xf32>
    %c6 = arith.constant 6 : index
    %c0_17 = arith.constant 0 : index
    %c0_18 = arith.constant 0 : index
    %33 = vector.load %arg2[%c6, %c0_17, %c0_18] : memref<9x4x512xf32, #tpu.memory_space<vmem>>, vector<1x4x512xf32>
    %34 = vector.shape_cast %33 : vector<1x4x512xf32> to vector<4x512xf32>
    %35 = arith.mulf %34, %32 : vector<4x512xf32>
    %36 = arith.addf %31, %35 : vector<4x512xf32>
    %c496_i32 = arith.constant 496 : i32
    %37 = tpu.dynamic_rotate %1 by %c496_i32 dim 1 : vector<4x512xf32>, i32 -> vector<4x512xf32>
    %c7 = arith.constant 7 : index
    %c0_19 = arith.constant 0 : index
    %c0_20 = arith.constant 0 : index
    %38 = vector.load %arg2[%c7, %c0_19, %c0_20] : memref<9x4x512xf32, #tpu.memory_space<vmem>>, vector<1x4x512xf32>
    %39 = vector.shape_cast %38 : vector<1x4x512xf32> to vector<4x512xf32>
    %40 = arith.mulf %39, %37 : vector<4x512xf32>
    %41 = arith.addf %36, %40 : vector<4x512xf32>
    %c495_i32 = arith.constant 495 : i32
    %42 = tpu.dynamic_rotate %1 by %c495_i32 dim 1 : vector<4x512xf32>, i32 -> vector<4x512xf32>
    %c8 = arith.constant 8 : index
    %c0_21 = arith.constant 0 : index
    %c0_22 = arith.constant 0 : index
    %43 = vector.load %arg2[%c8, %c0_21, %c0_22] : memref<9x4x512xf32, #tpu.memory_space<vmem>>, vector<1x4x512xf32>
    %44 = vector.shape_cast %43 : vector<1x4x512xf32> to vector<4x512xf32>
    %45 = arith.mulf %44, %42 : vector<4x512xf32>
    %46 = arith.addf %41, %45 : vector<4x512xf32>
    %cst = arith.constant 0.000000e+00 : f32
    %47 = vector.broadcast %cst : f32 to vector<4x256xf32>
    %c17_i32_23 = arith.constant 17 : i32
    %48 = tpu.dynamic_rotate %46 by %c17_i32_23 dim 1 : vector<4x512xf32>, i32 -> vector<4x512xf32>
    %c0_24 = arith.constant 0 : index
    %c0_25 = arith.constant 0 : index
    %c0_26 = arith.constant 0 : index
    %49 = vector.load %arg4[%c0_24, %c0_25, %c0_26] : memref<9x4x512xf32, #tpu.memory_space<vmem>>, vector<1x4x512xf32>
    %50 = vector.shape_cast %49 : vector<1x4x512xf32> to vector<4x512xf32>
    %51 = arith.mulf %50, %48 : vector<4x512xf32>
    %52 = vector.extract_strided_slice %51 {offsets = [0, 0], sizes = [4, 256], strides = [1, 1]} : vector<4x512xf32> to vector<4x256xf32>
    %53 = vector.extract_strided_slice %51 {offsets = [0, 256], sizes = [4, 256], strides = [1, 1]} : vector<4x512xf32> to vector<4x256xf32>
    %54 = arith.addf %52, %53 : vector<4x256xf32>
    %55 = arith.addf %47, %54 : vector<4x256xf32>
    %c16_i32_27 = arith.constant 16 : i32
    %56 = tpu.dynamic_rotate %46 by %c16_i32_27 dim 1 : vector<4x512xf32>, i32 -> vector<4x512xf32>
    %c1_28 = arith.constant 1 : index
    %c0_29 = arith.constant 0 : index
    %c0_30 = arith.constant 0 : index
    %57 = vector.load %arg4[%c1_28, %c0_29, %c0_30] : memref<9x4x512xf32, #tpu.memory_space<vmem>>, vector<1x4x512xf32>
    %58 = vector.shape_cast %57 : vector<1x4x512xf32> to vector<4x512xf32>
    %59 = arith.mulf %58, %56 : vector<4x512xf32>
    %60 = vector.extract_strided_slice %59 {offsets = [0, 0], sizes = [4, 256], strides = [1, 1]} : vector<4x512xf32> to vector<4x256xf32>
    %61 = vector.extract_strided_slice %59 {offsets = [0, 256], sizes = [4, 256], strides = [1, 1]} : vector<4x512xf32> to vector<4x256xf32>
    %62 = arith.addf %60, %61 : vector<4x256xf32>
    %63 = arith.addf %55, %62 : vector<4x256xf32>
    %c15_i32_31 = arith.constant 15 : i32
    %64 = tpu.dynamic_rotate %46 by %c15_i32_31 dim 1 : vector<4x512xf32>, i32 -> vector<4x512xf32>
    %c2_32 = arith.constant 2 : index
    %c0_33 = arith.constant 0 : index
    %c0_34 = arith.constant 0 : index
    %65 = vector.load %arg4[%c2_32, %c0_33, %c0_34] : memref<9x4x512xf32, #tpu.memory_space<vmem>>, vector<1x4x512xf32>
    %66 = vector.shape_cast %65 : vector<1x4x512xf32> to vector<4x512xf32>
    %67 = arith.mulf %66, %64 : vector<4x512xf32>
    %68 = vector.extract_strided_slice %67 {offsets = [0, 0], sizes = [4, 256], strides = [1, 1]} : vector<4x512xf32> to vector<4x256xf32>
    %69 = vector.extract_strided_slice %67 {offsets = [0, 256], sizes = [4, 256], strides = [1, 1]} : vector<4x512xf32> to vector<4x256xf32>
    %70 = arith.addf %68, %69 : vector<4x256xf32>
    %71 = arith.addf %63, %70 : vector<4x256xf32>
    %c1_i32_35 = arith.constant 1 : i32
    %72 = tpu.dynamic_rotate %46 by %c1_i32_35 dim 1 : vector<4x512xf32>, i32 -> vector<4x512xf32>
    %c3_36 = arith.constant 3 : index
    %c0_37 = arith.constant 0 : index
    %c0_38 = arith.constant 0 : index
    %73 = vector.load %arg4[%c3_36, %c0_37, %c0_38] : memref<9x4x512xf32, #tpu.memory_space<vmem>>, vector<1x4x512xf32>
    %74 = vector.shape_cast %73 : vector<1x4x512xf32> to vector<4x512xf32>
    %75 = arith.mulf %74, %72 : vector<4x512xf32>
    %76 = vector.extract_strided_slice %75 {offsets = [0, 0], sizes = [4, 256], strides = [1, 1]} : vector<4x512xf32> to vector<4x256xf32>
    %77 = vector.extract_strided_slice %75 {offsets = [0, 256], sizes = [4, 256], strides = [1, 1]} : vector<4x512xf32> to vector<4x256xf32>
    %78 = arith.addf %76, %77 : vector<4x256xf32>
    %79 = arith.addf %71, %78 : vector<4x256xf32>
    %c4_39 = arith.constant 4 : index
    %c0_40 = arith.constant 0 : index
    %c0_41 = arith.constant 0 : index
    %80 = vector.load %arg4[%c4_39, %c0_40, %c0_41] : memref<9x4x512xf32, #tpu.memory_space<vmem>>, vector<1x4x512xf32>
    %81 = vector.shape_cast %80 : vector<1x4x512xf32> to vector<4x512xf32>
    %82 = arith.mulf %81, %46 : vector<4x512xf32>
    %83 = vector.extract_strided_slice %82 {offsets = [0, 0], sizes = [4, 256], strides = [1, 1]} : vector<4x512xf32> to vector<4x256xf32>
    %84 = vector.extract_strided_slice %82 {offsets = [0, 256], sizes = [4, 256], strides = [1, 1]} : vector<4x512xf32> to vector<4x256xf32>
    %85 = arith.addf %83, %84 : vector<4x256xf32>
    %86 = arith.addf %79, %85 : vector<4x256xf32>
    %c511_i32_42 = arith.constant 511 : i32
    %87 = tpu.dynamic_rotate %46 by %c511_i32_42 dim 1 : vector<4x512xf32>, i32 -> vector<4x512xf32>
    %c5_43 = arith.constant 5 : index
    %c0_44 = arith.constant 0 : index
    %c0_45 = arith.constant 0 : index
    %88 = vector.load %arg4[%c5_43, %c0_44, %c0_45] : memref<9x4x512xf32, #tpu.memory_space<vmem>>, vector<1x4x512xf32>
    %89 = vector.shape_cast %88 : vector<1x4x512xf32> to vector<4x512xf32>
    %90 = arith.mulf %89, %87 : vector<4x512xf32>
    %91 = vector.extract_strided_slice %90 {offsets = [0, 0], sizes = [4, 256], strides = [1, 1]} : vector<4x512xf32> to vector<4x256xf32>
    %92 = vector.extract_strided_slice %90 {offsets = [0, 256], sizes = [4, 256], strides = [1, 1]} : vector<4x512xf32> to vector<4x256xf32>
    %93 = arith.addf %91, %92 : vector<4x256xf32>
    %94 = arith.addf %86, %93 : vector<4x256xf32>
    %c497_i32_46 = arith.constant 497 : i32
    %95 = tpu.dynamic_rotate %46 by %c497_i32_46 dim 1 : vector<4x512xf32>, i32 -> vector<4x512xf32>
    %c6_47 = arith.constant 6 : index
    %c0_48 = arith.constant 0 : index
    %c0_49 = arith.constant 0 : index
    %96 = vector.load %arg4[%c6_47, %c0_48, %c0_49] : memref<9x4x512xf32, #tpu.memory_space<vmem>>, vector<1x4x512xf32>
    %97 = vector.shape_cast %96 : vector<1x4x512xf32> to vector<4x512xf32>
    %98 = arith.mulf %97, %95 : vector<4x512xf32>
    %99 = vector.extract_strided_slice %98 {offsets = [0, 0], sizes = [4, 256], strides = [1, 1]} : vector<4x512xf32> to vector<4x256xf32>
    %100 = vector.extract_strided_slice %98 {offsets = [0, 256], sizes = [4, 256], strides = [1, 1]} : vector<4x512xf32> to vector<4x256xf32>
    %101 = arith.addf %99, %100 : vector<4x256xf32>
    %102 = arith.addf %94, %101 : vector<4x256xf32>
    %c496_i32_50 = arith.constant 496 : i32
    %103 = tpu.dynamic_rotate %46 by %c496_i32_50 dim 1 : vector<4x512xf32>, i32 -> vector<4x512xf32>
    %c7_51 = arith.constant 7 : index
    %c0_52 = arith.constant 0 : index
    %c0_53 = arith.constant 0 : index
    %104 = vector.load %arg4[%c7_51, %c0_52, %c0_53] : memref<9x4x512xf32, #tpu.memory_space<vmem>>, vector<1x4x512xf32>
    %105 = vector.shape_cast %104 : vector<1x4x512xf32> to vector<4x512xf32>
    %106 = arith.mulf %105, %103 : vector<4x512xf32>
    %107 = vector.extract_strided_slice %106 {offsets = [0, 0], sizes = [4, 256], strides = [1, 1]} : vector<4x512xf32> to vector<4x256xf32>
    %108 = vector.extract_strided_slice %106 {offsets = [0, 256], sizes = [4, 256], strides = [1, 1]} : vector<4x512xf32> to vector<4x256xf32>
    %109 = arith.addf %107, %108 : vector<4x256xf32>
    %110 = arith.addf %102, %109 : vector<4x256xf32>
    %c495_i32_54 = arith.constant 495 : i32
    %111 = tpu.dynamic_rotate %46 by %c495_i32_54 dim 1 : vector<4x512xf32>, i32 -> vector<4x512xf32>
    %c8_55 = arith.constant 8 : index
    %c0_56 = arith.constant 0 : index
    %c0_57 = arith.constant 0 : index
    %112 = vector.load %arg4[%c8_55, %c0_56, %c0_57] : memref<9x4x512xf32, #tpu.memory_space<vmem>>, vector<1x4x512xf32>
    %113 = vector.shape_cast %112 : vector<1x4x512xf32> to vector<4x512xf32>
    %114 = arith.mulf %113, %111 : vector<4x512xf32>
    %115 = vector.extract_strided_slice %114 {offsets = [0, 0], sizes = [4, 256], strides = [1, 1]} : vector<4x512xf32> to vector<4x256xf32>
    %116 = vector.extract_strided_slice %114 {offsets = [0, 256], sizes = [4, 256], strides = [1, 1]} : vector<4x512xf32> to vector<4x256xf32>
    %117 = arith.addf %115, %116 : vector<4x256xf32>
    %118 = arith.addf %110, %117 : vector<4x256xf32>
    %c0_58 = arith.constant 0 : index
    %c0_59 = arith.constant 0 : index
    %119 = vector.load %arg5[%c0_58, %c0_59] : memref<4x4xf32, #tpu.memory_space<vmem>>, vector<4x4xf32>
    %120 = vector.extract_strided_slice %1 {offsets = [0, 0], sizes = [4, 256], strides = [1, 1]} : vector<4x512xf32> to vector<4x256xf32>
    %cst_60 = arith.constant dense<0.000000e+00> : vector<4x256xf32>
    %121 = tpu.matmul %119, %120, %cst_60 {dimension_numbers = #tpu.dot_dimension_numbers<[1], [0], [0], [1], [0, 0, 1, 1], [], []>} : vector<4x4xf32>, vector<4x256xf32>, vector<4x256xf32> -> vector<4x256xf32>
    %c0_61 = arith.constant 0 : index
    %c0_62 = arith.constant 0 : index
    %122 = vector.load %arg6[%c0_61, %c0_62] : memref<4x4xf32, #tpu.memory_space<vmem>>, vector<4x4xf32>
    %123 = vector.extract_strided_slice %1 {offsets = [0, 256], sizes = [4, 256], strides = [1, 1]} : vector<4x512xf32> to vector<4x256xf32>
    %cst_63 = arith.constant dense<0.000000e+00> : vector<4x256xf32>
    %124 = tpu.matmul %122, %123, %cst_63 {dimension_numbers = #tpu.dot_dimension_numbers<[1], [0], [0], [1], [0, 0, 1, 1], [], []>} : vector<4x4xf32>, vector<4x256xf32>, vector<4x256xf32> -> vector<4x256xf32>
    %125 = arith.addf %121, %124 : vector<4x256xf32>
    %126 = arith.addf %118, %125 : vector<4x256xf32>
    %c0_64 = arith.constant 0 : index
    %c0_65 = arith.constant 0 : index
    %127 = vector.load %arg7[%c0_64, %c0_65] : memref<4x1xf32, #tpu.memory_space<vmem>>, vector<4x1xf32>
    %128 = vector.broadcast %127 : vector<4x1xf32> to vector<4x256xf32>
    %129 = arith.addf %126, %128 : vector<4x256xf32>
    %cst_66 = arith.constant 5.000000e-01 : f32
    %130 = vector.broadcast %cst_66 : f32 to vector<4x256xf32>
    %131 = arith.mulf %130, %129 : vector<4x256xf32>
    %cst_67 = arith.constant 0.707106769 : f32
    %132 = vector.broadcast %cst_67 : f32 to vector<4x256xf32>
    %133 = arith.mulf %129, %132 : vector<4x256xf32>
    %cst_68 = arith.constant -4.000000e+00 : f32
    %cst_69 = arith.constant 4.000000e+00 : f32
    %134 = vector.broadcast %cst_68 : f32 to vector<4x256xf32>
    %135 = arith.maximumf %134, %133 : vector<4x256xf32>
    %136 = vector.broadcast %cst_69 : f32 to vector<4x256xf32>
    %137 = arith.minimumf %136, %135 : vector<4x256xf32>
    %138 = arith.mulf %137, %137 : vector<4x256xf32>
    %cst_70 = arith.constant -2.72614237E-10 : f32
    %139 = vector.broadcast %cst_70 : f32 to vector<4x256xf32>
    %140 = arith.mulf %139, %138 : vector<4x256xf32>
    %cst_71 = arith.constant 2.77068146E-8 : f32
    %141 = vector.broadcast %cst_71 : f32 to vector<4x256xf32>
    %142 = arith.addf %140, %141 : vector<4x256xf32>
    %143 = arith.mulf %142, %138 : vector<4x256xf32>
    %cst_72 = arith.constant -2.10102394E-6 : f32
    %144 = vector.broadcast %cst_72 : f32 to vector<4x256xf32>
    %145 = arith.addf %143, %144 : vector<4x256xf32>
    %146 = arith.mulf %145, %138 : vector<4x256xf32>
    %cst_73 = arith.constant -5.69250624E-5 : f32
    %147 = vector.broadcast %cst_73 : f32 to vector<4x256xf32>
    %148 = arith.addf %146, %147 : vector<4x256xf32>
    %149 = arith.mulf %148, %138 : vector<4x256xf32>
    %cst_74 = arith.constant -7.34990637E-4 : f32
    %150 = vector.broadcast %cst_74 : f32 to vector<4x256xf32>
    %151 = arith.addf %149, %150 : vector<4x256xf32>
    %152 = arith.mulf %151, %138 : vector<4x256xf32>
    %cst_75 = arith.constant -2.954600e-03 : f32
    %153 = vector.broadcast %cst_75 : f32 to vector<4x256xf32>
    %154 = arith.addf %152, %153 : vector<4x256xf32>
    %155 = arith.mulf %154, %138 : vector<4x256xf32>
    %cst_76 = arith.constant -0.0160960332 : f32
    %156 = vector.broadcast %cst_76 : f32 to vector<4x256xf32>
    %157 = arith.addf %155, %156 : vector<4x256xf32>
    %158 = arith.mulf %157, %137 : vector<4x256xf32>
    %cst_77 = arith.constant -1.45660715E-5 : f32
    %159 = vector.broadcast %cst_77 : f32 to vector<4x256xf32>
    %160 = arith.mulf %159, %138 : vector<4x256xf32>
    %cst_78 = arith.constant -2.13374049E-4 : f32
    %161 = vector.broadcast %cst_78 : f32 to vector<4x256xf32>
    %162 = arith.addf %160, %161 : vector<4x256xf32>
    %163 = arith.mulf %162, %138 : vector<4x256xf32>
    %cst_79 = arith.constant -0.00168282702 : f32
    %164 = vector.broadcast %cst_79 : f32 to vector<4x256xf32>
    %165 = arith.addf %163, %164 : vector<4x256xf32>
    %166 = arith.mulf %165, %138 : vector<4x256xf32>
    %cst_80 = arith.constant -0.00737332925 : f32
    %167 = vector.broadcast %cst_80 : f32 to vector<4x256xf32>
    %168 = arith.addf %166, %167 : vector<4x256xf32>
    %169 = arith.mulf %168, %138 : vector<4x256xf32>
    %cst_81 = arith.constant -0.0142647391 : f32
    %170 = vector.broadcast %cst_81 : f32 to vector<4x256xf32>
    %171 = arith.addf %169, %170 : vector<4x256xf32>
    %172 = arith.divf %158, %171 : vector<4x256xf32>
    %cst_82 = arith.constant 1.000000e+00 : f32
    %173 = vector.broadcast %cst_82 : f32 to vector<4x256xf32>
    %174 = arith.addf %173, %172 : vector<4x256xf32>
    %175 = arith.mulf %131, %174 : vector<4x256xf32>
    %c0_83 = arith.constant 0 : index
    %c0_84 = arith.constant 0 : index
    %c0_85 = arith.constant 0 : index
    %176 = vector.load %arg8[%c0_83, %c0_84, %c0_85] : memref<1x4x256xf32, #tpu.memory_space<vmem>>, vector<1x4x256xf32>
    %177 = vector.shape_cast %176 : vector<1x4x256xf32> to vector<4x256xf32>
    %178 = vector.shape_cast %175 : vector<4x256xf32> to vector<1x4x256xf32>
    tpu.vector_store %arg8[%c0_83, %c0_84, %c0_85], %178 {strides = array<i32>} : memref<1x4x256xf32, #tpu.memory_space<vmem>>, vector<1x4x256xf32>,
    return
  }
  func.func @transform_0(%arg0: i32) -> (i32, i32, i32) {
    %c0_i32 = arith.constant 0 : i32
    %c0_i32_0 = arith.constant 0 : i32
    %c0_i32_1 = arith.constant 0 : i32
    return %arg0, %c0_i32, %c0_i32_0 : i32, i32, i32
  }
  func.func @transform_1(%arg0: i32) -> (i32, i32, i32) {
    %c0_i32 = arith.constant 0 : i32
    %c0_i32_0 = arith.constant 0 : i32
    %c0_i32_1 = arith.constant 0 : i32
    %c0_i32_2 = arith.constant 0 : i32
    return %c0_i32, %c0_i32_0, %c0_i32_1 : i32, i32, i32
  }
  func.func @transform_2(%arg0: i32) -> (i32, i32) {
    %c0_i32 = arith.constant 0 : i32
    %c0_i32_0 = arith.constant 0 : i32
    %c0_i32_1 = arith.constant 0 : i32
    return %c0_i32, %c0_i32_0 : i32, i32
  }
  func.func @transform_3(%arg0: i32) -> (i32, i32, i32) {
    %c0_i32 = arith.constant 0 : i32
    %c0_i32_0 = arith.constant 0 : i32
    %c0_i32_1 = arith.constant 0 : i32
    %c0_i32_2 = arith.constant 0 : i32
    return %c0_i32, %c0_i32_0, %c0_i32_1 : i32, i32, i32
  }
  func.func @transform_4(%arg0: i32) -> (i32, i32) {
    %c0_i32 = arith.constant 0 : i32
    %c0_i32_0 = arith.constant 0 : i32
    %c0_i32_1 = arith.constant 0 : i32
    return %c0_i32, %c0_i32_0 : i32, i32
  }
  func.func @transform_5(%arg0: i32) -> (i32, i32) {
    %c0_i32 = arith.constant 0 : i32
    %c0_i32_0 = arith.constant 0 : i32
    %c0_i32_1 = arith.constant 0 : i32
    return %c0_i32, %c0_i32_0 : i32, i32
  }
  func.func @transform_6(%arg0: i32) -> (i32, i32) {
    %c0_i32 = arith.constant 0 : i32
    %c0_i32_0 = arith.constant 0 : i32
    %c0_i32_1 = arith.constant 0 : i32
    return %c0_i32, %c0_i32_0 : i32, i32
  }
  func.func @transform_7(%arg0: i32) -> (i32, i32, i32) {
    %c0_i32 = arith.constant 0 : i32
    %c0_i32_0 = arith.constant 0 : i32
    %c0_i32_1 = arith.constant 0 : i32
    return %arg0, %c0_i32, %c0_i32_0 : i32, i32, i32
  }
}

</mosaic_0001>

<bundles_post_ra>
// kernel: modulate_forward.1
= control target key start
LH: loop header
LB: loop body
LE: loop exit
PB: predicated region body
PF: predicated region fallthrough
CT: control target
= control target key end

     0   :  { %12 = vsyncpa [#allocation3], 0  ;;  %s1969_s0 = inlined_call_operand.vmem [shape: f32[2,4,512], index: 0, kind: input, shape index: {}]   ;;  %s1970_s1 = inlined_call_operand.vmem [shape: f32[9,4,512], index: 1, kind: input, shape index: {}]   ;;  %s1971_s2 = inlined_call_operand.hbm [shape: f32[4,512], index: 2, kind: input, shape index: {}]   ;;  %s1972_s3 = inlined_call_operand.vmem [shape: f32[9,4,512], index: 3, kind: input, shape index: {}]   ;;  %s1973_s4 = inlined_call_operand.vmem [shape: f32[4,4], index: 4, kind: input, shape index: {}]   ;;  %s1974_s5 = inlined_call_operand.hbm [shape: f32[4,4], index: 5, kind: input, shape index: {}]   ;;  %s1975_s6 = inlined_call_operand.vmem [shape: f32[4,1], index: 6, kind: input, shape index: {}]   ;;  %s1976_s7 = inlined_call_operand.vmem [shape: f32[2,4,256], index: 7, kind: output, shape index: {}]  }
   0x1   :  { %13 = vsyncpa [#allocation5], 0  ;;  %s1450_s24 = smov 0  }
   0x2 LB: > { %s217_s27 = sshll.u32 %s1971_s2, 4  ;;  %s1221_s28 = sadd.s32 4294967295, %s1396_s24   ;;  %s1396_s24 = sphi %s1450_s24, %s19_s24   ;;  %s218_s27 = int_to_ptr.hbm [resolvable:$true] %s217_s27 }
   0x3   : > { %p1223_p0 = scmp.ge.s32.totalorder %s1396_s24, 1  ;;  %p202_p1 = scmp.lt.s32.totalorder %s1396_s24, 3 }
   0x4   : > { %p1294_p2 = scmp.eq.s32.totalorder %s1221_s28, 0  ;;  %s1398_s30 = smov [#allocation2]  }
   0x5   : > { %p1461_p3 = pnand %p1223_p0, %p202_p1  ;;  %s219_s8 = sshll.u32 %s1398_s30, 4  ;;  %s220_s8 = int_to_ptr.vmem [resolvable:$true] %s219_s8 }
   0x6   : > { %s235_s11 = sshll.u32 %s1974_s5, 4  ;;  %s1399_s12 = smov [#allocation4]   ;;  %s236_s11 = int_to_ptr.hbm [resolvable:$true] %s235_s11 }
   0x7   : > { %p1287_p4 = pneg %p1461_p3  ;;  %s237_s13 = sshll.u32 %s1399_s12, 4  ;;  %s238_s13 = int_to_ptr.vmem [resolvable:$true] %s237_s13 }
   0x8   : > { %261 = sbr.rel (%p1461_p3) target bundleno = 493 (0x1ed), region = 48 }
   0x9   : > { %p1288_p5 = pnand %p1294_p2, %p1287_p4 }
   0xb   : > { %1290 = dma.hbm_to_vmem [thread:$0]  (!%p1288_p5), %s218_s27, 256, %s220_s8, [#allocation3]  }
   0xc   : > { %1293 = dma.hbm_to_vmem [thread:$0]  (!%p1288_p5), %s236_s11, 64, %s238_s13, [#allocation5]  }
   0xd   : > { %1387 = dma.done.wait (%p1294_p2), [#allocation3], 256  }
   0xe   : > { %1389 = vsyncadd (%p1294_p2), [#allocation3], 4294967040 }
   0xf   : > { %1391 = dma.done.wait (%p1294_p2), [#allocation5], 64  }
  0x10   : > { %1393 = vsyncadd (%p1294_p2), [#allocation5], 4294967232  ;;  %p299_p6 = scmp.lt.s32.totalorder %s1221_s28, 1  ;;  %s1400_s18 = smov 17   ;;  %v334_v44 = vlaneseq  ;;  %vm349_vm3 = vcmask 1043456   ;;  %v341_v57 = vld [vmem:[%s1970_s1] sm:$0xff] }
  0x11   : > { %s1401_s19 = smov 16   ;;  %s1402_s20 = smov 15   ;;  %vm985_vm9 = vcmask 31744  }
  0x12   : > { %s1979_s28 = smov (!%p299_p6, %s1221_s28), 1  ;;  %s1403_s21 = smov 1   ;;  %v1559_v47 = vand.u32 127, %v334_v44  ;;  %v1244_v44 = vld [vmem:[%s1970_s1 + $0x60] sm:$0xff] }
  0x13   : > { %s1277_s14 = sshll.u32 %s1979_s28, 4  ;;  %s1404_s22 = smov 127  }
  0x14   : > { %s303_s17 = scalar_lea.vmem %s1969_s0, %s1277_s14  ;;  %s1405_s23 = smov 113   ;;  %vm336_vm0 = vcmp.lt.s32.totalorder %v1559_v47, 17  ;;  %vm377_vm1 = vcmp.lt.s32.totalorder %v1559_v47, 16  ;;  %vm418_vm2 = vcmp.lt.s32.totalorder %v1559_v47, 15  ;;  %vm459_vm4 = vcmp.lt.s32.totalorder %v1559_v47, 1 }
  0x15   : > { %v1483_v0 = vld [vmem:[%s303_s17 + $0x8] sm:$0xff]  ;;  %v1485_v1 = vld [vmem:[%s303_s17] sm:$0xff]  ;;  %s1406_s25 = smov 112   ;;  %s1407_s26 = smov 111   ;;  %vm507_vm5 = vcmp.lt.s32.totalorder %v1559_v47, 127  ;;  %vm548_vm6 = vcmp.lt.s32.totalorder %v1559_v47, 113 }
  0x16   : > { %317 = vst [vmem:[#allocation1 + $0x10] ss:$2 sm:$0xff] %v1483_v0  ;;  %vm589_vm7 = vcmp.lt.s32.totalorder %v1559_v47, 112  ;;  %vm630_vm8 = vcmp.lt.s32.totalorder %v1559_v47, 111  ;;  %s1278_s13 = sshll.u32 %s1979_s28, 3 }
  0x17   : > { %315 = vst [vmem:[#allocation1] ss:$2 sm:$0xff] %v1485_v1  ;;  %s308_s16 = scalar_lea.vmem %s1976_s7, %s1278_s13 }
  0x1d   : > { %v321_v2 = vld.sshfl [vmem:[#allocation1 + $0x18] sm:$0xff pattern:$0x75316420]  ;;  %v1489_v3 = vld.sshfl [vmem:[#allocation1 + $0x10] sm:$0xff pattern:$0x75316420] }
  0x1e   : > { %332 = vrot.lane.b32.xlu1 %v321_v2, %s1400_s18  ;;  %360 = vst [vmem:[#allocation1 + $0x10] ss:$2 sm:$0xff] %v1483_v0  ;;  %v318_v4 = vld.sshfl [vmem:[#allocation1] sm:$0xff pattern:$0x75316420] }
  0x1f   : > { %326 = vrot.lane.b32.xlu0 %v318_v4, %s1400_s18  ;;  %v319_v5 = vld.sshfl [vmem:[#allocation1 + $0x8] sm:$0xff pattern:$0x75316420] }
  0x20   : > { %358 = vst [vmem:[#allocation1] ss:$2 sm:$0xff] %v1485_v1 }
  0x25   : > { %v1495_v6 = vld.sshfl [vmem:[#allocation1 + $0x10] sm:$0xff pattern:$0x75316420]  ;;  %v364_v7 = vld.sshfl [vmem:[#allocation1 + $0x18] sm:$0xff pattern:$0x75316420] }
  0x26   : > { %401 = vst [vmem:[#allocation1 + $0x10] ss:$2 sm:$0xff] %v1483_v0 }
  0x27   : > { %328 = vrot.lane.b32.xlu0 %v319_v5, %s1400_s18  ;;  %v362_v8 = vld.sshfl [vmem:[#allocation1 + $0x8] sm:$0xff pattern:$0x75316420]  ;;  %v361_v9 = vld.sshfl [vmem:[#allocation1] sm:$0xff pattern:$0x75316420] }
  0x28   : > { %371 = vrot.lane.b32.xlu2 %v362_v8, %s1401_s19  ;;  %369 = vrot.lane.b32.xlu1 %v361_v9, %s1401_s19  ;;  %399 = vst [vmem:[#allocation1] ss:$2 sm:$0xff] %v1485_v1  ;;  %v1234_v8 = vld [vmem:[%s1970_s1 + $0x10] sm:$0xff] }
  0x2d   : > { %v404_v10 = vld.sshfl [vmem:[#allocation1 + $0x10] sm:$0xff pattern:$0x75316420]  ;;  %v405_v11 = vld.sshfl [vmem:[#allocation1 + $0x18] sm:$0xff pattern:$0x75316420] }
  0x2e   : > { %442 = vst [vmem:[#allocation1 + $0x10] ss:$2 sm:$0xff] %v1483_v0 }
  0x2f   : > { %v403_v12 = vld.sshfl [vmem:[#allocation1 + $0x8] sm:$0xff pattern:$0x75316420]  ;;  %v402_v13 = vld.sshfl [vmem:[#allocation1] sm:$0xff pattern:$0x75316420] }
  0x30   : > { %375 = vrot.lane.b32.xlu2 %v364_v7, %s1401_s19  ;;  %412 = vrot.lane.b32.xlu1 %v403_v12, %s1402_s20  ;;  %440 = vst [vmem:[#allocation1] ss:$2 sm:$0xff] %v1485_v1 }
  0x31   : > { %410 = vrot.lane.b32.xlu0 %v402_v13, %s1402_s20 }
  0x35   : > { %v445_v14 = vld.sshfl [vmem:[#allocation1 + $0x10] sm:$0xff pattern:$0x75316420]  ;;  %v446_v15 = vld.sshfl [vmem:[#allocation1 + $0x18] sm:$0xff pattern:$0x75316420] }
  0x36   : > { %490 = vst [vmem:[#allocation1 + $0x10] ss:$2 sm:$0xff] %v1483_v0 }
  0x37   : > { %v444_v16 = vld.sshfl [vmem:[#allocation1 + $0x8] sm:$0xff pattern:$0x75316420]  ;;  %v443_v17 = vld.sshfl [vmem:[#allocation1] sm:$0xff pattern:$0x75316420] }
  0x38   : > { %416 = vrot.lane.b32.xlu2 %v405_v11, %s1402_s20  ;;  %453 = vrot.lane.b32.xlu1 %v444_v16, %s1403_s21  ;;  %488 = vst [vmem:[#allocation1] ss:$2 sm:$0xff] %v1485_v1 }
  0x39   : > { %451 = vrot.lane.b32.xlu0 %v443_v17, %s1403_s21 }
  0x3d   : > { %v493_v18 = vld.sshfl [vmem:[#allocation1 + $0x10] sm:$0xff pattern:$0x75316420]  ;;  %v494_v19 = vld.sshfl [vmem:[#allocation1 + $0x18] sm:$0xff pattern:$0x75316420] }
  0x3e   : > { %531 = vst [vmem:[#allocation1 + $0x10] ss:$2 sm:$0xff] %v1483_v0 }
  0x3f   : > { %v492_v20 = vld.sshfl [vmem:[#allocation1 + $0x8] sm:$0xff pattern:$0x75316420]  ;;  %v491_v21 = vld.sshfl [vmem:[#allocation1] sm:$0xff pattern:$0x75316420] }
  0x40   : > { %457 = vrot.lane.b32.xlu2 %v446_v15, %s1403_s21  ;;  %503 = vrot.lane.b32.xlu1 %v493_v18, %s1404_s22  ;;  %529 = vst [vmem:[#allocation1] ss:$2 sm:$0xff] %v1485_v1  ;;  %v1238_v15 = vld [vmem:[%s1970_s1 + $0x30] sm:$0xff] }
  0x41   : > { %501 = vrot.lane.b32.xlu0 %v492_v20, %s1404_s22 }
  0x45   : > { %v534_v22 = vld.sshfl [vmem:[#allocation1 + $0x10] sm:$0xff pattern:$0x75316420]  ;;  %v535_v23 = vld.sshfl [vmem:[#allocation1 + $0x18] sm:$0xff pattern:$0x75316420] }
  0x46   : > { %572 = vst [vmem:[#allocation1 + $0x10] ss:$2 sm:$0xff] %v1483_v0 }
  0x47   : > { %v533_v24 = vld.sshfl [vmem:[#allocation1 + $0x8] sm:$0xff pattern:$0x75316420]  ;;  %v532_v25 = vld.sshfl [vmem:[#allocation1] sm:$0xff pattern:$0x75316420] }
  0x48   : > { %544 = vrot.lane.b32.xlu1 %v534_v22, %s1405_s23  ;;  %499 = vrot.lane.b32.xlu2 %v491_v21, %s1404_s22  ;;  %570 = vst [vmem:[#allocation1] ss:$2 sm:$0xff] %v1485_v1 }
  0x49   : > { %542 = vrot.lane.b32.xlu0 %v533_v24, %s1405_s23  ;;  %v1240_v24 = vld [vmem:[%s1970_s1 + $0x40] sm:$0xff] }
  0x4d   : > { %v575_v26 = vld.sshfl [vmem:[#allocation1 + $0x10] sm:$0xff pattern:$0x75316420]  ;;  %v576_v27 = vld.sshfl [vmem:[#allocation1 + $0x18] sm:$0xff pattern:$0x75316420] }
  0x4e   : > { %613 = vst [vmem:[#allocation1 + $0x10] ss:$2 sm:$0xff] %v1483_v0 }
  0x4f   : > { %v574_v28 = vld.sshfl [vmem:[#allocation1 + $0x8] sm:$0xff pattern:$0x75316420]  ;;  %v573_v29 = vld.sshfl [vmem:[#allocation1] sm:$0xff pattern:$0x75316420] }
  0x50   : > { %585 = vrot.lane.b32.xlu1 %v575_v26, %s1406_s25  ;;  %540 = vrot.lane.b32.xlu2 %v532_v25, %s1405_s23  ;;  %611 = vst [vmem:[#allocation1] ss:$2 sm:$0xff] %v1485_v1 }
  0x51   : > { %583 = vrot.lane.b32.xlu0 %v574_v28, %s1406_s25 }
  0x55   : > { %v616_v30 = vld.sshfl [vmem:[#allocation1 + $0x10] sm:$0xff pattern:$0x75316420]  ;;  %v617_v33 = vld.sshfl [vmem:[#allocation1 + $0x18] sm:$0xff pattern:$0x75316420] }
  0x57   : > { %v615_v31 = vld.sshfl [vmem:[#allocation1 + $0x8] sm:$0xff pattern:$0x75316420]  ;;  %v614_v32 = vld.sshfl [vmem:[#allocation1] sm:$0xff pattern:$0x75316420] }
  0x58   : > { %626 = vrot.lane.b32.xlu1 %v616_v30, %s1407_s26  ;;  %581 = vrot.lane.b32.xlu2 %v573_v29, %s1406_s25  ;;  %v1242_v30 = vld [vmem:[%s1970_s1 + $0x50] sm:$0xff] }
  0x59   : > { %624 = vrot.lane.b32.xlu0 %v615_v31, %s1407_s26 }
  0x60   : > { %373 = vrot.lane.b32.xlu1 %v1495_v6, %s1401_s19  ;;  %622 = vrot.lane.b32.xlu2 %v614_v32, %s1407_s26 }
  0x61   : > { %330 = vrot.lane.b32.xlu0 %v1489_v3, %s1400_s18  ;;  %v311_v3 = vld [vmem:[#allocation2] sm:$0xff] }
  0x68   : > { %505 = vrot.lane.b32.xlu1 %v494_v19, %s1404_s22  ;;  %414 = vrot.lane.b32.xlu2 %v404_v10, %s1402_s20  ;;  %v1236_v10 = vld [vmem:[%s1970_s1 + $0x20] sm:$0xff] }
  0x69   : > { %455 = vrot.lane.b32.xlu0 %v445_v14, %s1403_s21 }
  0x70   : > { %628 = vrot.lane.b32.xlu1 %v617_v33, %s1407_s26  ;;  %546 = vrot.lane.b32.xlu2 %v535_v23, %s1405_s23 }
  0x71   : > { %587 = vrot.lane.b32.xlu0 %v576_v27, %s1406_s25 }
  0x82   : > { %v1541_v34 = vpop.permute.xlu2 %371 }
  0x8a   : > { %v1543_v35 = vpop.permute.xlu2 %375 }
  0x90   : > { %v1545_v36 = vpop.permute.xlu1 %332 }
  0x91   : > { %v327_v37 = vpop.permute.xlu0 %326 }
  0x92   : > { %v1547_v38 = vpop.permute.xlu2 %416  ;;  %v340_v54 = vsel %vm336_vm0, %v1545_v36, %v327_v37 }
  0x99   : > { %v1549_v39 = vpop.permute.xlu0 %328 }
  0x9a   : > { %v370_v40 = vpop.permute.xlu1 %369  ;;  %v1551_v41 = vpop.permute.xlu2 %457  ;;  %v339_v49 = vsel %vm336_vm0, %v327_v37, %v1549_v39 }
  0x9b   : > { %v347_v52 = vrot.slane %v339_v49, 4  ;;  %v380_v55 = vsel %vm377_vm1, %v370_v40, %v1541_v34  ;;  %v381_v63 = vsel %vm377_vm1, %v1543_v35, %v370_v40  ;;  %v484_v40 = vmul.f32 %v1240_v24, %v1485_v1 }
  0x9c   : > { %v389_v60 = vrot.slane %v380_v55, 4 }
  0x9d   : > { %v350_v58 = vsel %vm349_vm3, %v340_v54, %v347_v52 }
  0x9e   : > { %v354_v62 = vmul.f32 %v350_v58, %v341_v57  ;;  %v391_v9 = vsel %vm349_vm3, %v381_v63, %v389_v60 }
  0x9f   : > { %v395_v17 = vmul.f32 %v1234_v8, %v391_v9 }
  0xa0   : > { %v356_v12 = vadd.f32 %v354_v62, %v311_v3  ;;  %v1248_v62 = vld [vmem:[%s1970_s1 + $0x80] sm:$0xff] }
  0xa2   : > { %v1553_v42 = vpop.permute.xlu1 %412  ;;  %v1555_v45 = vpop.permute.xlu2 %499  ;;  %v397_v21 = vadd.f32 %v395_v17, %v356_v12  ;;  %v342_v17 = vld [vmem:[%s1970_s1 + $0x8] sm:$0xff] }
  0xa3   : > { %v411_v43 = vpop.permute.xlu0 %410 }
  0xa4   : > { %v421_v56 = vsel %vm418_vm2, %v411_v43, %v1553_v42  ;;  %v422_v7 = vsel %vm418_vm2, %v1547_v38, %v411_v43 }
  0xa5   : > { %v430_v61 = vrot.slane %v421_v56, 4 }
  0xa7   : > { %v432_v11 = vsel %vm349_vm3, %v422_v7, %v430_v61 }
  0xa8   : > { %v436_v18 = vmul.f32 %v1236_v10, %v432_v11 }
  0xaa   : > { %v1557_v46 = vpop.permute.xlu1 %453  ;;  %v1565_v50 = vpop.permute.xlu2 %540  ;;  %v438_v27 = vadd.f32 %v436_v18, %v397_v21  ;;  %v312_v21 = vld [vmem:[#allocation2 + $0x8] sm:$0xff] }
  0xab   : > { %v452_v48 = vpop.permute.xlu0 %451 }
  0xac   : > { %v462_v59 = vsel %vm459_vm4, %v452_v48, %v1557_v46  ;;  %v463_v13 = vsel %vm459_vm4, %v1551_v41, %v452_v48 }
  0xad   : > { %v471_v4 = vrot.slane %v462_v59, 4 }
  0xaf   : > { %v473_v16 = vsel %vm349_vm3, %v463_v13, %v471_v4 }
  0xb0   : > { %v477_v22 = vmul.f32 %v1238_v15, %v473_v16 }
  0xb2   : > { %v1567_v51 = vpop.permute.xlu1 %503  ;;  %v1594_v5 = vpop.permute.xlu2 %581  ;;  %v479_v37 = vadd.f32 %v477_v22, %v438_v27 }
  0xb3   : > { %v502_v53 = vpop.permute.xlu0 %501 }
  0xb4   : > { %v509_v14 = vsel %vm507_vm5, %v502_v53, %v1567_v51  ;;  %v510_v28 = vsel %vm507_vm5, %v1555_v45, %v502_v53  ;;  %v1246_v53 = vld [vmem:[%s1970_s1 + $0x70] sm:$0xff]  ;;  %v486_v55 = vadd.f32 %v484_v40, %v479_v37 }
  0xb5   : > { %v519_v20 = vrot.slane %v509_v14, 4 }
  0xb7   : > { %v521_v31 = vsel %vm349_vm3, %v510_v28, %v519_v20  ;;  %v1235_v20 = vld [vmem:[%s1970_s1 + $0x18] sm:$0xff] }
  0xb8   : > { %v525_v49 = vmul.f32 %v1242_v30, %v521_v31 }
  0xba   : > { %v1591_v2 = vpop.permute.xlu1 %544  ;;  %v1637_v32 = vpop.permute.xlu2 %622  ;;  %v527_v59 = vadd.f32 %v525_v49, %v486_v55 }
  0xbb   : > { %v543_v6 = vpop.permute.xlu0 %542 }
  0xbc   : > { %v550_v19 = vsel %vm548_vm6, %v543_v6, %v1591_v2  ;;  %v551_v43 = vsel %vm548_vm6, %v1565_v50, %v543_v6 }
  0xbd   : > { %v560_v25 = vrot.slane %v550_v19, 4 }
  0xbf   : > { %v562_v48 = vsel %vm349_vm3, %v551_v43, %v560_v25 }
  0xc0   : > { %v566_v56 = vmul.f32 %v1244_v44, %v562_v48  ;;  %v1241_v48 = vld [vmem:[%s1970_s1 + $0x48] sm:$0xff] }
  0xc1   : > { %v485_v55 = vmul.f32 %v1241_v48, %v1483_v0 }
  0xc2   : > { %v1622_v23 = vpop.permute.xlu1 %585  ;;  %v568_v3 = vadd.f32 %v566_v56, %v527_v59  ;;  %v415_v6 = vpop.permute.xlu2 %414  ;;  %v1243_v59 = vld [vmem:[%s1970_s1 + $0x58] sm:$0xff] }
  0xc3   : > { %v584_v26 = vpop.permute.xlu0 %583  ;;  %v419_v14 = vsel %vm418_vm2, %v415_v6, %v1547_v38 }
  0xc4   : > { %v591_v29 = vsel %vm589_vm7, %v584_v26, %v1622_v23  ;;  %v592_v52 = vsel %vm589_vm7, %v1594_v5, %v584_v26  ;;  %v431_v19 = vrot.slane %v419_v14, 4 }
  0xc5   : > { %v601_v33 = vrot.slane %v591_v29, 4 }
  0xc7   : > { %v603_v54 = vsel %vm349_vm3, %v592_v52, %v601_v33 }
  0xc8   : > { %v607_v60 = vmul.f32 %v1246_v53, %v603_v54 }
  0xca   : > { %v1655_v57 = vpop.permute.xlu1 %626  ;;  %v609_v8 = vadd.f32 %v607_v60, %v568_v3  ;;  %v547_v25 = vpop.permute.xlu2 %546 }
  0xcb   : > { %v625_v58 = vpop.permute.xlu0 %624  ;;  %v552_v40 = vsel %vm548_vm6, %v547_v25, %v1565_v50 }
  0xcc   : > { %v632_v61 = vsel %vm630_vm8, %v625_v58, %v1655_v57  ;;  %v633_v4 = vsel %vm630_vm8, %v1637_v32, %v625_v58  ;;  %v561_v52 = vrot.slane %v552_v40, 4 }
  0xcd   : > { %v642_v63 = vrot.slane %v632_v61, 4 }
  0xcf   : > { %v644_v7 = vsel %vm349_vm3, %v633_v4, %v642_v63 }
  0xd0   : > { %v648_v9 = vmul.f32 %v1248_v62, %v644_v7 }
  0xd2   : > { %v1667_v10 = vadd.f32 %v648_v9, %v609_v8  ;;  %v374_v11 = vpop.permute.xlu1 %373 }
  0xd3   : > { %v378_v12 = vsel %vm377_vm1, %v374_v11, %v1543_v35  ;;  %v331_v13 = vpop.permute.xlu0 %330  ;;  %v379_v35 = vsel %vm377_vm1, %v1541_v34, %v374_v11  ;;  %v1237_v34 = vld [vmem:[%s1970_s1 + $0x28] sm:$0xff]  ;;  %v1247_v11 = vld [vmem:[%s1970_s1 + $0x78] sm:$0xff] }
  0xd4   : > { %654 = vst [vmem:[#allocation1] ss:$2 sm:$0xff] %v1667_v10  ;;  %v390_v15 = vrot.slane %v378_v12, 4  ;;  %v337_v16 = vsel %vm336_vm0, %v331_v13, %v1545_v36  ;;  %v338_v38 = vsel %vm336_vm0, %v1549_v39, %v331_v13  ;;  %v420_v39 = vsel %vm418_vm2, %v1553_v42, %v415_v6 }
  0xd5   : > { %v348_v18 = vrot.slane %v337_v16, 4  ;;  %v433_v29 = vsel %vm349_vm3, %v420_v39, %v431_v19 }
  0xd6   : > { %v392_v36 = vsel %vm349_vm3, %v379_v35, %v390_v15  ;;  %v437_v50 = vmul.f32 %v1237_v34, %v433_v29 }
  0xd7   : > { %v351_v22 = vsel %vm349_vm3, %v338_v38, %v348_v18  ;;  %v396_v26 = vmul.f32 %v1235_v20, %v392_v36 }
  0xd8   : > { %v355_v24 = vmul.f32 %v351_v22, %v342_v17 }
  0xda   : > { %v357_v27 = vadd.f32 %v355_v24, %v312_v21  ;;  %v506_v28 = vpop.permute.xlu1 %505 }
  0xdb   : > { %v511_v30 = vsel %vm507_vm5, %v506_v28, %v1555_v45  ;;  %v456_v31 = vpop.permute.xlu0 %455  ;;  %v658_v33 = vld.sshfl [vmem:[#allocation1 + $0x8] sm:$0xff pattern:$0x75316420]  ;;  %v657_v37 = vld.sshfl [vmem:[#allocation1] sm:$0xff pattern:$0x75316420]  ;;  %v508_v54 = vsel %vm507_vm5, %v1567_v51, %v506_v28 }
  0xdc   : > { %v398_v43 = vadd.f32 %v396_v26, %v357_v27  ;;  %v460_v42 = vsel %vm459_vm4, %v456_v31, %v1551_v41  ;;  %667 = vrot.lane.b32.xlu0 %v658_v33, %s1400_s18  ;;  %665 = vrot.lane.b32.xlu2 %v657_v37, %s1400_s18  ;;  %v520_v44 = vrot.slane %v511_v30, 4  ;;  %v1239_v45 = vld [vmem:[%s1970_s1 + $0x38] sm:$0xff]  ;;  %693 = vst [vmem:[#allocation1] ss:$2 sm:$0xff] %v1667_v10  ;;  %v1245_v51 = vld [vmem:[%s1970_s1 + $0x68] sm:$0xff] }
  0xdd   : > { %v472_v49 = vrot.slane %v460_v42, 4  ;;  %v461_v41 = vsel %vm459_vm4, %v1557_v46, %v456_v31  ;;  %v549_v46 = vsel %vm548_vm6, %v1591_v2, %v547_v25 }
  0xde   : > { %v439_v56 = vadd.f32 %v437_v50, %v398_v43  ;;  %v522_v60 = vsel %vm349_vm3, %v508_v54, %v520_v44  ;;  %v563_v63 = vsel %vm349_vm3, %v549_v46, %v561_v52 }
  0xdf   : > { %v474_v53 = vsel %vm349_vm3, %v461_v41, %v472_v49  ;;  %v526_v6 = vmul.f32 %v1243_v59, %v522_v60  ;;  %v567_v14 = vmul.f32 %v1245_v51, %v563_v63  ;;  %v1089_v63 = vld [vmem:[%s1975_s6] sm:$0xf] }
  0xe0   : > { %v478_v58 = vmul.f32 %v1239_v45, %v474_v53 }
  0xe2   : > { %v480_v61 = vadd.f32 %v478_v58, %v439_v56  ;;  %v629_v62 = vpop.permute.xlu1 %628 }
  0xe3   : > { %v634_v3 = vsel %vm630_vm8, %v629_v62, %v1637_v32  ;;  %v588_v4 = vpop.permute.xlu0 %587  ;;  %v696_v9 = vld.sshfl [vmem:[#allocation1] sm:$0xff pattern:$0x75316420]  ;;  %v697_v13 = vld.sshfl [vmem:[#allocation1 + $0x8] sm:$0xff pattern:$0x75316420]  ;;  %v631_v32 = vsel %vm630_vm8, %v1655_v57, %v629_v62 }
  0xe4   : > { %v487_v7 = vadd.f32 %v485_v55, %v480_v61  ;;  %v643_v8 = vrot.slane %v634_v3, 4  ;;  %v593_v2 = vsel %vm589_vm7, %v588_v4, %v1594_v5  ;;  %704 = vrot.lane.b32.xlu0 %v696_v9, %s1401_s19  ;;  %v590_v16 = vsel %vm589_vm7, %v1622_v23, %v588_v4  ;;  %733 = vst [vmem:[#allocation1] ss:$2 sm:$0xff] %v1667_v10  ;;  %v1249_v5 = vld [vmem:[%s1970_s1 + $0x88] sm:$0xff]  ;;  %v1256_v57 = vld [vmem:[%s1972_s3 + $0x40] sm:$0xff] }
  0xe5   : > { %v602_v12 = vrot.slane %v593_v2, 4  ;;  %v1257_v23 = vld [vmem:[%s1972_s3 + $0x48] sm:$0xff]  ;;  %v816_v24 = vmul.f32 %v1256_v57, %v1667_v10 }
  0xe6   : > { %v528_v15 = vadd.f32 %v526_v6, %v487_v7  ;;  %v645_v17 = vsel %vm349_vm3, %v631_v32, %v643_v8 }
  0xe7   : > { %v604_v18 = vsel %vm349_vm3, %v590_v16, %v602_v12  ;;  %v649_v19 = vmul.f32 %v1249_v5, %v645_v17  ;;  %v678_v16 = vld [vmem:[%s1972_s3 + $0x8] sm:$0xff] }
  0xe8   : > { %v569_v35 = vadd.f32 %v567_v14, %v528_v15  ;;  %v608_v38 = vmul.f32 %v1247_v11, %v604_v18  ;;  %v677_v15 = vld [vmem:[%s1972_s3] sm:$0xff] }
  0xea   : > { %v610_v20 = vadd.f32 %v608_v38, %v569_v35 }
  0xeb   : > { %v736_v21 = vld.sshfl [vmem:[#allocation1] sm:$0xff pattern:$0x75316420]  ;;  %v737_v22 = vld.sshfl [vmem:[#allocation1 + $0x8] sm:$0xff pattern:$0x75316420] }
  0xec   : > { %v1765_v36 = vadd.f32 %v649_v19, %v610_v20  ;;  %773 = vst [vmem:[#allocation1] ss:$2 sm:$0xff] %v1667_v10 }
  0xee   : > { %656 = vst [vmem:[#allocation1 + $0x10] ss:$2 sm:$0xff] %v1765_v36  ;;  %v817_v25 = vmul.f32 %v1257_v23, %v1765_v36 }
  0xf0   : > { %v1771_v34 = vadd.f32 %v817_v25, %v816_v24 }
  0xf3   : > { %v776_v27 = vld.sshfl [vmem:[#allocation1] sm:$0xff pattern:$0x75316420]  ;;  %v777_v28 = vld.sshfl [vmem:[#allocation1 + $0x8] sm:$0xff pattern:$0x75316420] }
  0xf4   : > { %820 = vst [vmem:[#allocation1] ss:$2 sm:$0xff] %v1667_v10 }
  0xf5   : > { %v660_v39 = vld.sshfl [vmem:[#allocation1 + $0x18] sm:$0xff pattern:$0x75316420]  ;;  %v659_v26 = vld.sshfl [vmem:[#allocation1 + $0x10] sm:$0xff pattern:$0x75316420] }
  0xf6   : > { %671 = vrot.lane.b32.xlu2 %v660_v39, %s1400_s18  ;;  %669 = vrot.lane.b32.xlu1 %v659_v26, %s1400_s18  ;;  %695 = vst [vmem:[#allocation1 + $0x10] ss:$2 sm:$0xff] %v1765_v36 }
  0xfb   : > { %v823_v31 = vld.sshfl [vmem:[#allocation1] sm:$0xff pattern:$0x75316420]  ;;  %v824_v33 = vld.sshfl [vmem:[#allocation1 + $0x8] sm:$0xff pattern:$0x75316420] }
  0xfc   : > { %860 = vst [vmem:[#allocation1] ss:$2 sm:$0xff] %v1667_v10 }
  0xfd   : > { %v699_v29 = vld.sshfl [vmem:[#allocation1 + $0x18] sm:$0xff pattern:$0x75316420]  ;;  %v698_v30 = vld.sshfl [vmem:[#allocation1 + $0x10] sm:$0xff pattern:$0x75316420] }
  0xfe   : > { %706 = vrot.lane.b32.xlu1 %v697_v13, %s1401_s19  ;;  %710 = vrot.lane.b32.xlu0 %v699_v29, %s1401_s19  ;;  %735 = vst [vmem:[#allocation1 + $0x10] ss:$2 sm:$0xff] %v1765_v36 }
  0xff   : > { %708 = vrot.lane.b32.xlu2 %v698_v30, %s1401_s19 }
 0x103   : > { %v863_v43 = vld.sshfl [vmem:[#allocation1] sm:$0xff pattern:$0x75316420]  ;;  %v864_v42 = vld.sshfl [vmem:[#allocation1 + $0x8] sm:$0xff pattern:$0x75316420] }
 0x104   : > { %900 = vst [vmem:[#allocation1] ss:$2 sm:$0xff] %v1667_v10 }
 0x105   : > { %v738_v37 = vld.sshfl [vmem:[#allocation1 + $0x10] sm:$0xff pattern:$0x75316420]  ;;  %v739_v40 = vld.sshfl [vmem:[#allocation1 + $0x18] sm:$0xff pattern:$0x75316420] }
 0x106   : > { %744 = vrot.lane.b32.xlu1 %v736_v21, %s1402_s20  ;;  %748 = vrot.lane.b32.xlu0 %v738_v37, %s1402_s20  ;;  %775 = vst [vmem:[#allocation1 + $0x10] ss:$2 sm:$0xff] %v1765_v36  ;;  %v1250_v37 = vld [vmem:[%s1972_s3 + $0x10] sm:$0xff] }
 0x107   : > { %746 = vrot.lane.b32.xlu2 %v737_v22, %s1402_s20 }
 0x10b   : > { %v903_v48 = vld.sshfl [vmem:[#allocation1] sm:$0xff pattern:$0x75316420]  ;;  %v904_v49 = vld.sshfl [vmem:[#allocation1 + $0x8] sm:$0xff pattern:$0x75316420] }
 0x10c   : > { %940 = vst [vmem:[#allocation1] ss:$2 sm:$0xff] %v1667_v10  ;;  %v981_v10 = vld [vmem:[#allocation4] sm:$0xf] }
 0x10d   : > { %v779_v44 = vld.sshfl [vmem:[#allocation1 + $0x18] sm:$0xff pattern:$0x75316420]  ;;  %v778_v45 = vld.sshfl [vmem:[#allocation1 + $0x10] sm:$0xff pattern:$0x75316420] }
 0x10e   : > { %750 = vrot.lane.b32.xlu1 %v739_v40, %s1402_s20  ;;  %786 = vrot.lane.b32.xlu0 %v777_v28, %s1403_s21  ;;  %822 = vst [vmem:[#allocation1 + $0x10] ss:$2 sm:$0xff] %v1765_v36  ;;  %v1251_v40 = vld [vmem:[%s1972_s3 + $0x18] sm:$0xff] }
 0x10f   : > { %784 = vrot.lane.b32.xlu2 %v776_v27, %s1403_s21 }
 0x113   : > { %v943_v52 = vld.sshfl [vmem:[#allocation1] sm:$0xff pattern:$0x75316420]  ;;  %v944_v53 = vld.sshfl [vmem:[#allocation1 + $0x8] sm:$0xff pattern:$0x75316420] }
 0x114   : > { %982 = vst [vmem:[#allocation1] ss:$2 sm:$0xff] %v1483_v0  ;;  %v1408_v0 = vmov 0  }
 0x115   : > { %v826_v50 = vld.sshfl [vmem:[#allocation1 + $0x18] sm:$0xff pattern:$0x75316420]  ;;  %v825_v41 = vld.sshfl [vmem:[#allocation1 + $0x10] sm:$0xff pattern:$0x75316420]  ;;  %1318 = vset.pattern.permute.xlu1 %v1408_v0  ;;  %1319 = vset.pattern.permute.xlu0 %v1408_v0 }
 0x116   : > { %831 = vrot.lane.b32.xlu0 %v823_v31, %s1404_s22  ;;  %788 = vrot.lane.b32.xlu1 %v778_v45, %s1403_s21  ;;  %862 = vst [vmem:[#allocation1 + $0x10] ss:$2 sm:$0xff] %v1765_v36 }
 0x117   : > { %790 = vrot.lane.b32.xlu2 %v779_v44, %s1403_s21 }
 0x11b   : > { %v983_v56 = vld.sshfl [vmem:[#allocation1] sm:$0xff pattern:$0x75316420]  ;;  %v984_v58 = vld.sshfl [vmem:[#allocation1 + $0x8] sm:$0xff pattern:$0x75316420] }
 0x11c   : > { %1033 = vst [vmem:[#allocation1] ss:$2 sm:$0xff] %v1485_v1  ;;  %1268 = vmatpush.msk.msra.mxu1 %vm349_vm3, %v984_v58  ;;  %1266 = vmatpush.msk.msra.mxu0 %vm349_vm3, %v983_v56  ;;  %v980_v1 = vld [vmem:[%s1973_s4] sm:$0xf] }
 0x11d   : > { %v865_v54 = vld.sshfl [vmem:[#allocation1 + $0x10] sm:$0xff pattern:$0x75316420]  ;;  %v866_v55 = vld.sshfl [vmem:[#allocation1 + $0x18] sm:$0xff pattern:$0x75316420]  ;;  %1269 = vmatmul.msk.f32.vlgmr.msra.gmra.mxu1 %vm985_vm9, %v981_v10  ;;  %1267 = vmatmul.msk.f32.vlgmr.msra.gmra.mxu0 %vm985_vm9, %v981_v10 }
 0x11e   : > { %833 = vrot.lane.b32.xlu1 %v824_v33, %s1404_s22  ;;  %837 = vrot.lane.b32.xlu0 %v826_v50, %s1404_s22  ;;  %902 = vst [vmem:[#allocation1 + $0x10] ss:$2 sm:$0xff] %v1765_v36 }
 0x11f   : > { %835 = vrot.lane.b32.xlu2 %v825_v41, %s1404_s22  ;;  %v1253_v41 = vld [vmem:[%s1972_s3 + $0x28] sm:$0xff] }
 0x123   : > { %v1035_v46 = vld.sshfl [vmem:[#allocation1 + $0x8] sm:$0xff pattern:$0x75316420]  ;;  %v1034_v61 = vld.sshfl [vmem:[#allocation1] sm:$0xff pattern:$0x75316420] }
 0x124   : > { %1272 = vmatpush.msk.msra.mxu3 %vm349_vm3, %v1035_v46  ;;  %1270 = vmatpush.msk.msra.mxu2 %vm349_vm3, %v1034_v61 }
 0x125   : > { %v906_v59 = vld.sshfl [vmem:[#allocation1 + $0x18] sm:$0xff pattern:$0x75316420]  ;;  %v905_v60 = vld.sshfl [vmem:[#allocation1 + $0x10] sm:$0xff pattern:$0x75316420]  ;;  %1273 = vmatmul.msk.f32.vlgmr.msra.gmra.mxu3 %vm985_vm9, %v980_v1  ;;  %1271 = vmatmul.msk.f32.vlgmr.msra.gmra.mxu2 %vm985_vm9, %v980_v1 }
 0x126   : > { %871 = vrot.lane.b32.xlu1 %v863_v43, %s1405_s23  ;;  %875 = vrot.lane.b32.xlu0 %v865_v54, %s1405_s23  ;;  %942 = vst [vmem:[#allocation1 + $0x10] ss:$2 sm:$0xff] %v1765_v36 }
 0x127   : > { %873 = vrot.lane.b32.xlu2 %v864_v42, %s1405_s23 }
 0x12d   : > { %v946_v62 = vld.sshfl [vmem:[#allocation1 + $0x18] sm:$0xff pattern:$0x75316420]  ;;  %v945_v51 = vld.sshfl [vmem:[#allocation1 + $0x10] sm:$0xff pattern:$0x75316420] }
 0x12e   : > { %877 = vrot.lane.b32.xlu1 %v866_v55, %s1405_s23  ;;  %913 = vrot.lane.b32.xlu0 %v904_v49, %s1406_s25  ;;  %v1252_v55 = vld [vmem:[%s1972_s3 + $0x20] sm:$0xff] }
 0x12f   : > { %911 = vrot.lane.b32.xlu2 %v903_v48, %s1406_s25 }
 0x136   : > { %951 = vrot.lane.b32.xlu0 %v943_v52, %s1407_s26  ;;  %915 = vrot.lane.b32.xlu1 %v905_v60, %s1406_s25  ;;  %v666_v3 = vpop.permute.xlu2 %665 }
 0x137   : > { %917 = vrot.lane.b32.xlu2 %v906_v59, %s1406_s25 }
 0x13e   : > { %953 = vrot.lane.b32.xlu1 %v944_v53, %s1407_s26  ;;  %957 = vrot.lane.b32.xlu0 %v946_v62, %s1407_s26 }
 0x13f   : > { %955 = vrot.lane.b32.xlu2 %v945_v51, %s1407_s26  ;;  %v1254_v51 = vld [vmem:[%s1972_s3 + $0x30] sm:$0xff] }
 0x146   : > { %1092 = vperm.xlu1 %1318, %v1089_v63  }
 0x14e   : > { %v668_v4 = vpop.permute.xlu0 %667 }
 0x14f   : > { %v675_v6 = vsel %vm336_vm0, %v666_v3, %v668_v4 }
 0x150   : > { %v683_v7 = vrot.slane %v675_v6, 4  ;;  %v672_v8 = vpop.permute.xlu2 %671 }
 0x151   : > { %v676_v2 = vsel %vm336_vm0, %v672_v8, %v666_v3  ;;  %v1255_v3 = vld [vmem:[%s1972_s3 + $0x38] sm:$0xff] }
 0x152   : > { %v685_v9 = vsel %vm349_vm3, %v676_v2, %v683_v7 }
 0x153   : > { %v689_v35 = vmul.f32 %v685_v9, %v677_v15 }
 0x156   : > { %v705_v12 = vpop.permute.xlu0 %704 }
 0x159   : > { %v709_v11 = vpop.permute.xlu2 %708 }
 0x161   : > { %v747_v14 = vpop.permute.xlu2 %746 }
 0x168   : > { %v670_v13 = vpop.permute.xlu1 %669 }
 0x169   : > { %v673_v32 = vsel %vm336_vm0, %v670_v13, %v672_v8  ;;  %v674_v17 = vsel %vm336_vm0, %v668_v4, %v670_v13  ;;  %v785_v23 = vpop.permute.xlu2 %784 }
 0x16a   : > { %v684_v5 = vrot.slane %v673_v32, 4 }
 0x16c   : > { %v686_v18 = vsel %vm349_vm3, %v674_v17, %v684_v5 }
 0x16d   : > { %v690_v38 = vmul.f32 %v686_v18, %v678_v16 }
 0x16f   : > { %v691_v19 = vadd.f32 %v690_v38, %v689_v35 }
 0x170   : > { %v707_v20 = vpop.permute.xlu1 %706  ;;  %v711_v57 = vpop.permute.xlu0 %710 }
 0x171   : > { %v714_v22 = vsel %vm377_vm1, %v705_v12, %v707_v20  ;;  %v712_v24 = vsel %vm377_vm1, %v709_v11, %v711_v57  ;;  %v791_v25 = vpop.permute.xlu2 %790  ;;  %v713_v29 = vsel %vm377_vm1, %v707_v20, %v709_v11  ;;  %v715_v30 = vsel %vm377_vm1, %v711_v57, %v705_v12 }
 0x172   : > { %v723_v39 = vrot.slane %v714_v22, 4  ;;  %v724_v26 = vrot.slane %v712_v24, 4  ;;  %v795_v46 = vsel %vm459_vm4, %v791_v25, %v785_v23 }
 0x174   : > { %v725_v43 = vsel %vm349_vm3, %v715_v30, %v723_v39  ;;  %v726_v42 = vsel %vm349_vm3, %v713_v29, %v724_v26  ;;  %v1258_v39 = vld [vmem:[%s1972_s3 + $0x50] sm:$0xff] }
 0x175   : > { %v729_v53 = vmul.f32 %v1250_v37, %v725_v43  ;;  %v730_v54 = vmul.f32 %v1251_v40, %v726_v42 }
 0x177   : > { %v731_v1 = vadd.f32 %v730_v54, %v729_v53  ;;  %v1260_v54 = vld [vmem:[%s1972_s3 + $0x60] sm:$0xff] }
 0x178   : > { %v745_v36 = vpop.permute.xlu1 %744  ;;  %v749_v21 = vpop.permute.xlu0 %748 }
 0x179   : > { %v754_v31 = vsel %vm418_vm2, %v745_v36, %v747_v14  ;;  %v753_v45 = vsel %vm418_vm2, %v747_v14, %v749_v21  ;;  %v836_v58 = vpop.permute.xlu2 %835  ;;  %v732_v2 = vadd.f32 %v731_v1, %v691_v19 }
 0x17a   : > { %v763_v50 = vrot.slane %v754_v31, 4 }
 0x180   : > { %v751_v27 = vpop.permute.xlu1 %750  ;;  %v787_v28 = vpop.permute.xlu0 %786 }
 0x181   : > { %v752_v33 = vsel %vm418_vm2, %v749_v21, %v751_v27  ;;  %v755_v48 = vsel %vm418_vm2, %v751_v27, %v745_v36  ;;  %v794_v49 = vsel %vm459_vm4, %v785_v23, %v787_v28  ;;  %v874_v15 = vpop.permute.xlu2 %873 }
 0x182   : > { %v764_v44 = vrot.slane %v752_v33, 4  ;;  %v765_v10 = vsel %vm349_vm3, %v755_v48, %v763_v50  ;;  %v803_v56 = vrot.slane %v794_v49, 4 }
 0x183   : > { %v769_v61 = vmul.f32 %v1252_v55, %v765_v10  ;;  %v1262_v10 = vld [vmem:[%s1972_s3 + $0x70] sm:$0xff] }
 0x184   : > { %v766_v52 = vsel %vm349_vm3, %v753_v45, %v764_v44  ;;  %v805_v63 = vsel %vm349_vm3, %v795_v46, %v803_v56  ;;  %v1261_v44 = vld [vmem:[%s1972_s3 + $0x68] sm:$0xff] }
 0x185   : > { %v770_v0 = vmul.f32 %v1253_v41, %v766_v52  ;;  %v809_v9 = vmul.f32 %v1254_v51, %v805_v63 }
 0x187   : > { %v771_v6 = vadd.f32 %v770_v0, %v769_v61 }
 0x188   : > { %v832_v59 = vpop.permute.xlu0 %831  ;;  %v789_v60 = vpop.permute.xlu1 %788 }
 0x189   : > { %v792_v62 = vsel %vm459_vm4, %v789_v60, %v791_v25  ;;  %v793_v7 = vsel %vm459_vm4, %v787_v28, %v789_v60  ;;  %v772_v12 = vadd.f32 %v771_v6, %v732_v2  ;;  %v912_v35 = vpop.permute.xlu2 %911  ;;  %v1259_v28 = vld [vmem:[%s1972_s3 + $0x58] sm:$0xff]  ;;  %v1409_v6 = vmov 839922192  }
 0x18a   : > { %v804_v4 = vrot.slane %v792_v62, 4  ;;  %v1263_v60 = vld [vmem:[%s1972_s3 + $0x78] sm:$0xff] }
 0x18c   : > { %v806_v8 = vsel %vm349_vm3, %v793_v7, %v804_v4  ;;  %v1095_v7 = vunpack.c.l.s4 %v1409_v6 }
 0x18d   : > { %v810_v11 = vmul.f32 %v1255_v3, %v806_v8 }
 0x18f   : > { %v811_v13 = vadd.f32 %v810_v11, %v809_v9 }
 0x190   : > { %v834_v14 = vpop.permute.xlu1 %833  ;;  %v838_v32 = vpop.permute.xlu0 %837 }
 0x191   : > { %v812_v16 = vadd.f32 %v811_v13, %v772_v12  ;;  %v840_v38 = vsel %vm507_vm5, %v834_v14, %v836_v58  ;;  %v842_v19 = vsel %vm507_vm5, %v838_v32, %v832_v59  ;;  %v918_v22 = vpop.permute.xlu2 %917  ;;  %v841_v24 = vsel %vm507_vm5, %v832_v59, %v834_v14  ;;  %v1264_v14 = vld [vmem:[%s1972_s3 + $0x80] sm:$0xff] }
 0x192   : > { %v850_v23 = vrot.slane %v840_v38, 4  ;;  %v851_v21 = vrot.slane %v842_v19, 4  ;;  %v839_v27 = vsel %vm507_vm5, %v836_v58, %v838_v32  ;;  %v922_v37 = vsel %vm589_vm7, %v918_v22, %v912_v35 }
 0x193   : > { %v1894_v5 = vadd.f32 %v1771_v34, %v812_v16  ;;  %v931_v53 = vrot.slane %v922_v37, 4 }
 0x194   : > { %v852_v26 = vsel %vm349_vm3, %v841_v24, %v850_v23  ;;  %v853_v29 = vsel %vm349_vm3, %v839_v27, %v851_v21 }
 0x195   : > { %v856_v42 = vmul.f32 %v1258_v39, %v852_v26  ;;  %v857_v49 = vmul.f32 %v1259_v28, %v853_v29 }
 0x197   : > { %v858_v46 = vadd.f32 %v857_v49, %v856_v42 }
 0x198   : > { %v872_v17 = vpop.permute.xlu1 %871  ;;  %v876_v18 = vpop.permute.xlu0 %875 }
 0x199   : > { %v880_v34 = vsel %vm548_vm6, %v874_v15, %v876_v18  ;;  %v881_v50 = vsel %vm548_vm6, %v872_v17, %v874_v15  ;;  %v956_v62 = vpop.permute.xlu2 %955  ;;  %v1265_v15 = vld [vmem:[%s1972_s3 + $0x88] sm:$0xff] }
 0x19a   : > { %v890_v30 = vrot.slane %v880_v34, 4  ;;  %v1030_v0 = vpop.f32.mrf.mxu1  ;;  %v1010_v12 = vpop.f32.mrf.mxu0  ;;  %v1096_v34 = vunpack.c.0.s8 %v1095_v7 }
 0x19c   : > { %v892_v55 = vsel %vm349_vm3, %v881_v50, %v890_v30 }
 0x19d   : > { %v896_v61 = vmul.f32 %v1260_v54, %v892_v55 }
 0x1a0   : > { %v878_v20 = vpop.permute.xlu1 %877  ;;  %v914_v57 = vpop.permute.xlu0 %913 }
 0x1a1   : > { %v882_v36 = vsel %vm548_vm6, %v878_v20, %v872_v17  ;;  %v879_v40 = vsel %vm548_vm6, %v876_v18, %v878_v20  ;;  %v921_v41 = vsel %vm589_vm7, %v912_v35, %v914_v57  ;;  %v859_v17 = vadd.f32 %v858_v46, %v1894_v5 }
 0x1a2   : > { %v891_v25 = vrot.slane %v882_v36, 4 }
 0x1a4   : > { %v893_v45 = vsel %vm349_vm3, %v879_v40, %v891_v25 }
 0x1a5   : > { %v897_v58 = vmul.f32 %v1261_v44, %v893_v45 }
 0x1a7   : > { %v898_v8 = vadd.f32 %v897_v58, %v896_v61 }
 0x1a8   : > { %v952_v31 = vpop.permute.xlu0 %951  ;;  %v916_v33 = vpop.permute.xlu1 %915 }
 0x1a9   : > { %v920_v43 = vsel %vm589_vm7, %v914_v57, %v916_v33  ;;  %v919_v52 = vsel %vm589_vm7, %v916_v33, %v918_v22  ;;  %v1080_v59 = vpop.f32.mrf.mxu3  ;;  %v1060_v13 = vpop.f32.mrf.mxu2  ;;  %v899_v36 = vadd.f32 %v898_v8, %v859_v17 }
 0x1aa   : > { %v930_v48 = vrot.slane %v920_v43, 4  ;;  %v933_v1 = vsel %vm349_vm3, %v919_v52, %v931_v53  ;;  %v1081_v4 = vadd.f32 %v1080_v59, %v1030_v0  ;;  %v1061_v23 = vadd.f32 %v1060_v13, %v1010_v12 }
 0x1ab   : > { %v937_v2 = vmul.f32 %v1263_v60, %v933_v1 }
 0x1ac   : > { %v932_v56 = vsel %vm349_vm3, %v921_v41, %v930_v48  ;;  %v1085_v19 = vrot.slane %v1081_v4, 4 }
 0x1ad   : > { %v936_v51 = vmul.f32 %v1262_v10, %v932_v56 }
 0x1ae   : > { %v1086_v5 = vsel %vm349_vm3, %v1061_v23, %v1085_v19 }
 0x1af   : > { %v938_v18 = vadd.f32 %v937_v2, %v936_v51 }
 0x1b0   : > { %v954_v63 = vpop.permute.xlu1 %953  ;;  %v958_v3 = vpop.permute.xlu0 %957 }
 0x1b1   : > { %v960_v9 = vsel %vm630_vm8, %v954_v63, %v956_v62  ;;  %v962_v11 = vsel %vm630_vm8, %v958_v3, %v952_v31  ;;  %v961_v35 = vsel %vm630_vm8, %v952_v31, %v954_v63  ;;  %v959_v38 = vsel %vm630_vm8, %v956_v62, %v958_v3 }
 0x1b2   : > { %v970_v32 = vrot.slane %v960_v9, 4  ;;  %v971_v16 = vrot.slane %v962_v11, 4  ;;  %v939_v25 = vadd.f32 %v938_v18, %v899_v36 }
 0x1b4   : > { %v972_v20 = vsel %vm349_vm3, %v961_v35, %v970_v32  ;;  %v973_v57 = vsel %vm349_vm3, %v959_v38, %v971_v16 }
 0x1b5   : > { %v976_v21 = vmul.f32 %v1264_v14, %v972_v20  ;;  %v977_v22 = vmul.f32 %v1265_v15, %v973_v57 }
 0x1b7   : > { %v978_v24 = vadd.f32 %v977_v22, %v976_v21 }
 0x1b8   : > { %v1093_v39 = vpop.permute.xlu1 %1092 }
 0x1b9   : > { %v979_v26 = vadd.f32 %v978_v24, %v939_v25  ;;  %v1097_v27 = vperm.slane %v1093_v39, %v1096_v34 }
 0x1bb   : > { %v1088_v28 = vadd.f32 %v1086_v5, %v979_v26 }
 0x1bd   : > { %v1099_v47 = vadd.f32 %v1097_v27, %v1088_v28 }
 0x1bf   : > { %v1101_v29 = vmul.f32 0.70710677, %v1099_v47  ;;  %v1100_v2 = vmul.f32 0.5, %v1099_v47 }
 0x1c1   : > { %v1274_v30 = vclamps-f32 %v1101_v29, 4.0 }
 0x1c3   : > { %v1104_v31 = vmul.f32 %v1274_v30, %v1274_v30 }
 0x1c5   : > { %v1105_v33 = vmul.f32 -2.7261424e-10, %v1104_v31  ;;  %v1118_v37 = vmul.f32 -1.45660715e-05, %v1104_v31 }
 0x1c7   : > { %v1106_v40 = vadd.f32 2.7706815e-08, %v1105_v33  ;;  %v1119_v43 = vadd.f32 -0.00021337405, %v1118_v37 }
 0x1c9   : > { %v1107_v42 = vmul.f32 %v1106_v40, %v1104_v31  ;;  %v1120_v44 = vmul.f32 %v1119_v43, %v1104_v31 }
 0x1cb   : > { %v1108_v45 = vadd.f32 -2.101024e-06, %v1107_v42  ;;  %v1121_v48 = vadd.f32 -0.001682827, %v1120_v44 }
 0x1cd   : > { %v1109_v49 = vmul.f32 %v1108_v45, %v1104_v31  ;;  %v1122_v50 = vmul.f32 %v1121_v48, %v1104_v31 }
 0x1cf   : > { %v1110_v41 = vadd.f32 -5.6925062e-05, %v1109_v49  ;;  %v1123_v52 = vadd.f32 -0.0073733293, %v1122_v50 }
 0x1d1   : > { %v1111_v53 = vmul.f32 %v1110_v41, %v1104_v31  ;;  %v1124_v54 = vmul.f32 %v1123_v52, %v1104_v31 }
 0x1d3   : > { %v1112_v55 = vadd.f32 -0.00073499064, %v1111_v53  ;;  %v1125_v10 = vadd.f32 -0.014264739, %v1124_v54 }
 0x1d5   : > { %v1113_v56 = vmul.f32 %v1112_v55, %v1104_v31  ;;  %1320 = vrcp.f32 %v1125_v10  ;;  %v1137_v46 = vand.u32 2147483648, %v1125_v10  ;;  %v1135_v51 = vand.u32 2147483647, %v1125_v10 }
 0x1d6   : > { %vm1131_vm11 = vweird.f32 %v1125_v10 }
 0x1d7   : > { %v1114_v58 = vadd.f32 -0.0029546, %v1113_v56  ;;  %v1138_v3 = vor.u32 1.1754944e-38, %v1137_v46  ;;  %vm1136_vm13 = vcmp.eq.f32.partialorder %v1135_v51, 8.507059e+37 }
 0x1d9   : > { %v1115_v59 = vmul.f32 %v1114_v58, %v1104_v31 }
 0x1db   : > { %v1321_v0 = vpop.eup %1320  ;;  %v1116_v61 = vadd.f32 -0.016096033, %v1115_v59 }
 0x1dc   : > { %v1127_v60 = vmul.f32 %v1321_v0, %v1125_v10  ;;  %vm1132_vm10 = vweird.f32 %v1321_v0 }
 0x1dd   : > { %vm1133_vm12 = vmor %vm1131_vm11, %vm1132_vm10  ;;  %v1117_v4 = vmul.f32 %v1274_v30, %v1116_v61 }
 0x1de   : > { %v1128_v1 = vsub.f32 1.0, %v1127_v60 }
 0x1e0   : > { %v1129_v62 = vmul.f32 %v1321_v0, %v1128_v1 }
 0x1e2   : > { %v1130_v63 = vadd.f32 %v1321_v0, %v1129_v62 }
 0x1e4   : > { %v1134_v6 = vsel %vm1133_vm12, %v1321_v0, %v1130_v63 }
 0x1e5   : > { %v1139_v7 = vsel %vm1136_vm13, %v1138_v3, %v1134_v6 }
 0x1e6   : > { %v1140_v8 = vmul.f32 %v1139_v7, %v1117_v4 }
 0x1e8   : > { %v1141_v9 = vadd.f32 1.0, %v1140_v8 }
 0x1ea   : > { %v1142_v11 = vmul.f32 %v1141_v9, %v1100_v2 }
 0x1ec   : > { %1143 = vst [vmem:[%s308_s16] sm:$0xff] %v1142_v11 }
 0x1ed PF: > { %s19_s24 = sadd.s32 1, %s1396_s24  }
 0x1ee   : > { %p16_p7 = scmp.ge.s32.totalorder %s19_s24, 4  }
 0x1f0   :  { %18 = sbr.rel (!%p16_p7) target bundleno = 2 (0x2), region = 119 }
 0x1f5   :  { %1165 = vsyncpa [#allocation3], 1 }
 0x1f6   :  { %1167 = vsyncpa [#allocation3 + $0x1], 1 }
 0x1f7   :  { %1168 = vsyncpa [#allocation5], 1 }

</bundles_post_ra>
